<compile_context>
chip_gen: v7x
topology: tpu7x:2x2x1
jax: 0.10.0
libtpu: 0.0.40
codegen_flags: <defaults>
</compile_context>

<pallas_src>
import functools
import math

import jax
import jax.numpy as jnp
from jax.experimental import pallas as pl
from jax.experimental.pallas import tpu as pltpu


def _attention_kernel(x_ref, wq_ref, wk_ref, wv_ref, wout_ref,
                      bq_ref, bk_ref, bv_ref, bout_ref,
                      o_ref, k_scr, v_scr,
                      *, n_head: int, q_tile: int, compute_dtype, approx_recip: bool):
    T, C = x_ref.shape[1], x_ref.shape[2]
    H = n_head
    D = C // H
    TQ = q_tile
    scale = 1.0 / math.sqrt(D)
    cd = compute_dtype

    qi = pl.program_id(1)

    # --- K/V projection: once per batch element, cached head-major in VMEM scratch ---
    @pl.when(qi == 0)
    def _():
        xf = x_ref[0]                                                     # (T, C)
        k = jnp.dot(xf, wk_ref[...], preferred_element_type=jnp.float32) + bk_ref[...]
        v = jnp.dot(xf, wv_ref[...], preferred_element_type=jnp.float32) + bv_ref[...]
        # (T, C) -> (H, T, D): head on the leading axis so the attention matmuls are a
        # single batched MXU contraction over all heads (amortized over all q-tiles).
        k_scr[...] = k.reshape(T, H, D).transpose(1, 0, 2).astype(cd)
        v_scr[...] = v.reshape(T, H, D).transpose(1, 0, 2).astype(cd)

    # --- Q projection for this q tile (slice of the resident full-T x block) ---
    q_start = pl.multiple_of(qi * TQ, TQ)
    xq = x_ref[0, pl.ds(q_start, TQ), :]                                  # (TQ, C)
    q = jnp.dot(xq, wq_ref[...], preferred_element_type=jnp.float32) + bq_ref[...]
    q = q * scale                                                         # fold 1/sqrt(D)
    q_h = q.reshape(TQ, H, D).transpose(1, 0, 2).astype(cd)               # (H, TQ, D)

    # --- attention: batched over heads, contraction on D (no explicit k transpose) ---
    k_h = k_scr[...]                                                      # (H, T, D)
    v_h = v_scr[...]                                                      # (H, T, D)
    att = jnp.einsum('hqd,hkd->hqk', q_h, k_h,
                     preferred_element_type=jnp.float32)                  # (H, TQ, T) f32
    att = att - jnp.max(att, axis=-1, keepdims=True)                      # XLU reduce
    p = jnp.exp(att)                                                      # EUP
    denom = jnp.sum(p, axis=-1, keepdims=True)
    p = p * pl.reciprocal(denom, approx=approx_recip)
    # TODO(synk): attn_dropout would mask `p` here (identity at inference).
    y = jnp.einsum('hqk,hkd->hqd', p.astype(cd), v_h,
                   preferred_element_type=jnp.float32)                    # (H, TQ, D) f32
    y = y.transpose(1, 0, 2).reshape(TQ, C)                               # (TQ, C) f32

    # --- output projection ---
    out = jnp.dot(y.astype(cd), wout_ref[...],
                  preferred_element_type=jnp.float32) + bout_ref[...]
    # resid_dropout is identity at inference.
    o_ref[0] = out.astype(o_ref.dtype)


def self_attention(x, w_qkv, b_qkv, w_out, b_out, n_head: int,
                   q_tile: int | None = None,
                   compute_dtype=jnp.bfloat16,
                   vmem_limit_bytes: int | None = None):
    """x: (B, T, C). w_qkv: (C, 3C), b_qkv: (3C,), w_out: (C, C), b_out: (C,)."""
    B, T, C = x.shape
    assert C % n_head == 0
    D = C // n_head

    # Pick a q tile: full T for small sequences, else a 128/256/512 divisor of T.
    if q_tile is None:
        q_tile = T
        for cand in (512, 256, 128):
            if T > cand and T % cand == 0:
                q_tile = cand
                break
    assert T % q_tile == 0
    assert q_tile == T or q_tile % 8 == 0, "q_tile must be full T or a multiple of 8"
    nq = T // q_tile

    cd = compute_dtype
    approx_recip = jnp.dtype(cd) != jnp.dtype(jnp.float32)

    # Split fused QKV weights into lane-dense per-projection matrices (avoids in-kernel
    # slicing of the 3C axis) and cast matmul operands to the compute dtype once here.
    w_q = w_qkv[:, 0 * C:1 * C].astype(cd)
    w_k = w_qkv[:, 1 * C:2 * C].astype(cd)
    w_v = w_qkv[:, 2 * C:3 * C].astype(cd)
    w_o = w_out.astype(cd)
    b_q = b_qkv[0 * C:1 * C].reshape(1, C).astype(jnp.float32)
    b_k = b_qkv[1 * C:2 * C].reshape(1, C).astype(jnp.float32)
    b_v = b_qkv[2 * C:3 * C].reshape(1, C).astype(jnp.float32)
    b_o = b_out.reshape(1, C).astype(jnp.float32)
    x_c = x.astype(cd)

    kernel = functools.partial(_attention_kernel, n_head=n_head, q_tile=q_tile,
                               compute_dtype=cd, approx_recip=approx_recip)

    cp = dict(dimension_semantics=("parallel", "arbitrary"))
    if vmem_limit_bytes is not None:
        cp["vmem_limit_bytes"] = int(vmem_limit_bytes)

    grid_spec = pltpu.PrefetchScalarGridSpec(
        num_scalar_prefetch=0,
        grid=(B, nq),
        in_specs=[
            pl.BlockSpec((1, T, C), lambda b, q: (b, 0, 0)),   # x: full sequence per batch
            pl.BlockSpec((C, C), lambda b, q: (0, 0)),         # W_q (resident)
            pl.BlockSpec((C, C), lambda b, q: (0, 0)),         # W_k
            pl.BlockSpec((C, C), lambda b, q: (0, 0)),         # W_v
            pl.BlockSpec((C, C), lambda b, q: (0, 0)),         # W_out
            pl.BlockSpec((1, C), lambda b, q: (0, 0)),         # b_q
            pl.BlockSpec((1, C), lambda b, q: (0, 0)),         # b_k
            pl.BlockSpec((1, C), lambda b, q: (0, 0)),         # b_v
            pl.BlockSpec((1, C), lambda b, q: (0, 0)),         # b_out
        ],
        out_specs=pl.BlockSpec((1, q_tile, C), lambda b, q: (b, q, 0)),
        scratch_shapes=[
            pltpu.VMEM((n_head, T, D), cd),                    # K cache (head-major)
            pltpu.VMEM((n_head, T, D), cd),                    # V cache (head-major)
        ],
    )

    return pl.pallas_call(
        kernel,
        out_shape=jax.ShapeDtypeStruct((B, T, C), x.dtype),
        grid_spec=grid_spec,
        compiler_params=pltpu.CompilerParams(**cp),
    )(x_c, w_q, w_k, w_v, w_o, b_q, b_k, b_v, b_o)


def _reference(x, w_qkv, b_qkv, w_out, b_out, n_head):
    B, T, C = x.shape
    D = C // n_head
    qkv = x @ w_qkv + b_qkv                                   # (B, T, 3C)
    q, k, v = jnp.split(qkv, 3, axis=-1)

    def to_heads(t):
        return t.reshape(B, T, n_head, D).transpose(0, 2, 1, 3)   # (B, H, T, D)

    q, k, v = to_heads(q), to_heads(k), to_heads(v)
    att = jnp.einsum('bhqd,bhkd->bhqk', q, k) / math.sqrt(D)
    att = jax.nn.softmax(att, axis=-1)
    y = jnp.einsum('bhqt,bhtd->bhqd', att, v)
    y = y.transpose(0, 2, 1, 3).reshape(B, T, C)
    return y @ w_out + b_out


if __name__ == "__main__":
    # Toy shapes implied by the module: batch=2, seq=8, n_embd=32, n_head=4
    B, T, C, H = 2, 8, 32, 4
    key = jax.random.PRNGKey(0)
    k1, k2, k3, k4, k5 = jax.random.split(key, 5)

    x = jax.random.normal(k1, (B, T, C), dtype=jnp.float32)
    w_qkv = jax.random.normal(k2, (C, 3 * C), dtype=jnp.float32) / math.sqrt(C)
    b_qkv = jax.random.normal(k3, (3 * C,), dtype=jnp.float32) * 0.02
    w_out = jax.random.normal(k4, (C, C), dtype=jnp.float32) / math.sqrt(C)
    b_out = jax.random.normal(k5, (C,), dtype=jnp.float32) * 0.02

    ref = _reference(x, w_qkv, b_qkv, w_out, b_out, n_head=H)

    # 1) f32 verification path (exact reciprocal): tight check vs reference.
    out_f32 = jax.block_until_ready(
        self_attention(x, w_qkv, b_qkv, w_out, b_out, n_head=H,
                       compute_dtype=jnp.float32))
    assert out_f32.shape == (B, T, C)
    assert jnp.allclose(out_f32, ref, atol=1e-4, rtol=1e-4), "f32 kernel mismatch"

    # 2) bf16 fast path (MXU bf16 peak, f32 accumulation, EUP reciprocal): looser check.
    out_bf16 = jax.block_until_ready(
        self_attention(x, w_qkv, b_qkv, w_out, b_out, n_head=H,
                       compute_dtype=jnp.bfloat16))
    assert out_bf16.shape == (B, T, C)
    assert jnp.allclose(out_bf16, ref, atol=5e-2, rtol=5e-2), "bf16 kernel mismatch"

    # 3) Exercise the q-tiled path (grid = (B, T // q_tile)) with a slightly longer seq.
    T2 = 16
    x2 = jax.random.normal(jax.random.PRNGKey(1), (B, T2, C), dtype=jnp.float32)
    ref2 = _reference(x2, w_qkv, b_qkv, w_out, b_out, n_head=H)
    out_tiled = jax.block_until_ready(
        self_attention(x2, w_qkv, b_qkv, w_out, b_out, n_head=H,
                       q_tile=8, compute_dtype=jnp.float32))
    assert out_tiled.shape == (B, T2, C)
    assert jnp.allclose(out_tiled, ref2, atol=1e-4, rtol=1e-4), "q-tiled kernel mismatch"

    print("KERNEL_OK")
</pallas_src>

<mosaic_0001>
module attributes {stable_mosaic.version = 11 : i64} {
  func.func @_attention_kernel(%arg0: i32, %arg1: i32, %arg2: memref<1x8x32xf32, #tpu.memory_space<vmem>>, %arg3: memref<32x32xf32, #tpu.memory_space<vmem>>, %arg4: memref<32x32xf32, #tpu.memory_space<vmem>>, %arg5: memref<32x32xf32, #tpu.memory_space<vmem>>, %arg6: memref<32x32xf32, #tpu.memory_space<vmem>>, %arg7: memref<1x32xf32, #tpu.memory_space<vmem>>, %arg8: memref<1x32xf32, #tpu.memory_space<vmem>>, %arg9: memref<1x32xf32, #tpu.memory_space<vmem>>, %arg10: memref<1x32xf32, #tpu.memory_space<vmem>>, %arg11: memref<1x8x32xf32, #tpu.memory_space<vmem>>, %arg12: memref<4x8x8xf32, #tpu.memory_space<vmem>>, %arg13: memref<4x8x8xf32, #tpu.memory_space<vmem>>) attributes {dimension_semantics = [#tpu.dimension_semantics<parallel>, #tpu.dimension_semantics<arbitrary>], iteration_bounds = array<i64: 2, 1>, scalar_prefetch = 0 : i64, scratch_operands = 2 : i64, tpu.core_type = #tpu.core_type<tc>, window_params = [{transform_indices = @transform_0, window_bounds = array<i64: 1, 8, 32>}, {pipeline_mode = #tpu.pipeline_mode<synchronous>, transform_indices = @transform_1, window_bounds = array<i64: 32, 32>}, {pipeline_mode = #tpu.pipeline_mode<synchronous>, transform_indices = @transform_2, window_bounds = array<i64: 32, 32>}, {pipeline_mode = #tpu.pipeline_mode<synchronous>, transform_indices = @transform_3, window_bounds = array<i64: 32, 32>}, {pipeline_mode = #tpu.pipeline_mode<synchronous>, transform_indices = @transform_4, window_bounds = array<i64: 32, 32>}, {pipeline_mode = #tpu.pipeline_mode<synchronous>, transform_indices = @transform_5, window_bounds = array<i64: 1, 32>}, {pipeline_mode = #tpu.pipeline_mode<synchronous>, transform_indices = @transform_6, window_bounds = array<i64: 1, 32>}, {pipeline_mode = #tpu.pipeline_mode<synchronous>, transform_indices = @transform_7, window_bounds = array<i64: 1, 32>}, {pipeline_mode = #tpu.pipeline_mode<synchronous>, transform_indices = @transform_8, window_bounds = array<i64: 1, 32>}, {transform_indices = @transform_9, window_bounds = array<i64: 1, 8, 32>}]} {
    %c0_i32 = arith.constant 0 : i32
    %0 = arith.cmpi eq, %arg1, %c0_i32 : i32
    %1 = arith.extui %0 : i1 to i32
    %c0_i32_0 = arith.constant 0 : i32
    %2 = arith.cmpi ne, %1, %c0_i32_0 : i32
    scf.if %2 {
      %c0_25 = arith.constant 0 : index
      %c0_26 = arith.constant 0 : index
      %c0_27 = arith.constant 0 : index
      %41 = vector.load %arg2[%c0_25, %c0_26, %c0_27] : memref<1x8x32xf32, #tpu.memory_space<vmem>>, vector<1x8x32xf32>
      %42 = vector.shape_cast %41 : vector<1x8x32xf32> to vector<8x32xf32>
      %c0_28 = arith.constant 0 : index
      %c0_29 = arith.constant 0 : index
      %43 = vector.load %arg4[%c0_28, %c0_29] : memref<32x32xf32, #tpu.memory_space<vmem>>, vector<32x32xf32>
      %cst_30 = arith.constant dense<0.000000e+00> : vector<8x32xf32>
      %44 = tpu.matmul %42, %43, %cst_30 {dimension_numbers = #tpu.dot_dimension_numbers<[1], [0], [0], [1], [0, 0, 1, 1], [], []>} : vector<8x32xf32>, vector<32x32xf32>, vector<8x32xf32> -> vector<8x32xf32>
      %c0_31 = arith.constant 0 : index
      %c0_32 = arith.constant 0 : index
      %45 = vector.load %arg8[%c0_31, %c0_32] : memref<1x32xf32, #tpu.memory_space<vmem>>, vector<1x32xf32>
      %46 = vector.broadcast %45 : vector<1x32xf32> to vector<8x32xf32>
      %47 = arith.addf %44, %46 : vector<8x32xf32>
      %c0_33 = arith.constant 0 : index
      %c0_34 = arith.constant 0 : index
      %48 = vector.load %arg5[%c0_33, %c0_34] : memref<32x32xf32, #tpu.memory_space<vmem>>, vector<32x32xf32>
      %cst_35 = arith.constant dense<0.000000e+00> : vector<8x32xf32>
      %49 = tpu.matmul %42, %48, %cst_35 {dimension_numbers = #tpu.dot_dimension_numbers<[1], [0], [0], [1], [0, 0, 1, 1], [], []>} : vector<8x32xf32>, vector<32x32xf32>, vector<8x32xf32> -> vector<8x32xf32>
      %c0_36 = arith.constant 0 : index
      %c0_37 = arith.constant 0 : index
      %50 = vector.load %arg9[%c0_36, %c0_37] : memref<1x32xf32, #tpu.memory_space<vmem>>, vector<1x32xf32>
      %51 = vector.broadcast %50 : vector<1x32xf32> to vector<8x32xf32>
      %52 = arith.addf %49, %51 : vector<8x32xf32>
      %53 = vector.shape_cast %47 : vector<8x32xf32> to vector<8x4x8xf32>
      %54 = tpu.transpose %53, [1, 0, 2] : vector<8x4x8xf32> -> vector<4x8x8xf32>
      %c0_38 = arith.constant 0 : index
      %c0_39 = arith.constant 0 : index
      %c0_40 = arith.constant 0 : index
      %55 = vector.load %arg12[%c0_38, %c0_39, %c0_40] : memref<4x8x8xf32, #tpu.memory_space<vmem>>, vector<4x8x8xf32>
      tpu.vector_store %arg12[%c0_38, %c0_39, %c0_40], %54 {strides = array<i32>} : memref<4x8x8xf32, #tpu.memory_space<vmem>>, vector<4x8x8xf32>,
      %56 = vector.shape_cast %52 : vector<8x32xf32> to vector<8x4x8xf32>
      %57 = tpu.transpose %56, [1, 0, 2] : vector<8x4x8xf32> -> vector<4x8x8xf32>
      %c0_41 = arith.constant 0 : index
      %c0_42 = arith.constant 0 : index
      %c0_43 = arith.constant 0 : index
      %58 = vector.load %arg13[%c0_41, %c0_42, %c0_43] : memref<4x8x8xf32, #tpu.memory_space<vmem>>, vector<4x8x8xf32>
      tpu.vector_store %arg13[%c0_41, %c0_42, %c0_43], %57 {strides = array<i32>} : memref<4x8x8xf32, #tpu.memory_space<vmem>>, vector<4x8x8xf32>,
    } else {
    }
    %c8_i32 = arith.constant 8 : i32
    %3 = arith.muli %arg1, %c8_i32 : i32
    %4 = tpu.assume_multiple %3, 8 : i32
    %c0 = arith.constant 0 : index
    %5 = arith.index_cast %4 : i32 to index
    %c0_1 = arith.constant 0 : index
    %6 = vector.load %arg2[%c0, %5, %c0_1] : memref<1x8x32xf32, #tpu.memory_space<vmem>>, vector<1x8x32xf32>
    %7 = vector.shape_cast %6 : vector<1x8x32xf32> to vector<8x32xf32>
    %c0_2 = arith.constant 0 : index
    %c0_3 = arith.constant 0 : index
    %8 = vector.load %arg3[%c0_2, %c0_3] : memref<32x32xf32, #tpu.memory_space<vmem>>, vector<32x32xf32>
    %cst = arith.constant dense<0.000000e+00> : vector<8x32xf32>
    %9 = tpu.matmul %7, %8, %cst {dimension_numbers = #tpu.dot_dimension_numbers<[1], [0], [0], [1], [0, 0, 1, 1], [], []>} : vector<8x32xf32>, vector<32x32xf32>, vector<8x32xf32> -> vector<8x32xf32>
    %c0_4 = arith.constant 0 : index
    %c0_5 = arith.constant 0 : index
    %10 = vector.load %arg7[%c0_4, %c0_5] : memref<1x32xf32, #tpu.memory_space<vmem>>, vector<1x32xf32>
    %11 = vector.broadcast %10 : vector<1x32xf32> to vector<8x32xf32>
    %12 = arith.addf %9, %11 : vector<8x32xf32>
    %cst_6 = arith.constant 0.353553385 : f32
    %13 = vector.broadcast %cst_6 : f32 to vector<8x32xf32>
    %14 = arith.mulf %12, %13 : vector<8x32xf32>
    %15 = vector.shape_cast %14 : vector<8x32xf32> to vector<8x4x8xf32>
    %16 = tpu.transpose %15, [1, 0, 2] : vector<8x4x8xf32> -> vector<4x8x8xf32>
    %c0_7 = arith.constant 0 : index
    %c0_8 = arith.constant 0 : index
    %c0_9 = arith.constant 0 : index
    %17 = vector.load %arg12[%c0_7, %c0_8, %c0_9] : memref<4x8x8xf32, #tpu.memory_space<vmem>>, vector<4x8x8xf32>
    %c0_10 = arith.constant 0 : index
    %c0_11 = arith.constant 0 : index
    %c0_12 = arith.constant 0 : index
    %18 = vector.load %arg13[%c0_10, %c0_11, %c0_12] : memref<4x8x8xf32, #tpu.memory_space<vmem>>, vector<4x8x8xf32>
    "tpu.trace_start"() <{level = 10 : i32, message = "hqd,hkd->hqk"}> : () -> ()
    %cst_13 = arith.constant dense<0.000000e+00> : vector<4x8x8xf32>
    %19 = tpu.matmul %16, %17, %cst_13 {dimension_numbers = #tpu.dot_dimension_numbers<[2], [2], [1], [1], [0, 0, 0, 1, 1, 1], [0], [0]>} : vector<4x8x8xf32>, vector<4x8x8xf32>, vector<4x8x8xf32> -> vector<4x8x8xf32>
    "tpu.trace_stop"() : () -> ()
    %cst_14 = arith.constant dense<0xFF800000> : vector<4x8xf32>
    %20 = vector.multi_reduction <maximumf>, %19, %cst_14 [2] : vector<4x8x8xf32> to vector<4x8xf32>
    %21 = vector.shape_cast %20 : vector<4x8xf32> to vector<4x8x1xf32>
    %22 = vector.broadcast %21 : vector<4x8x1xf32> to vector<4x8x8xf32>
    %23 = arith.subf %19, %22 : vector<4x8x8xf32>
    %24 = math.exp %23 : vector<4x8x8xf32>
    %cst_15 = arith.constant dense<0.000000e+00> : vector<4x8xf32>
    %25 = vector.multi_reduction <add>, %24, %cst_15 [2] : vector<4x8x8xf32> to vector<4x8xf32>
    %26 = vector.shape_cast %25 : vector<4x8xf32> to vector<4x8x1xf32>
    %27 = tpu.reciprocal %26 : vector<4x8x1xf32> -> vector<4x8x1xf32>
    %28 = vector.broadcast %27 : vector<4x8x1xf32> to vector<4x8x8xf32>
    %29 = arith.mulf %24, %28 : vector<4x8x8xf32>
    "tpu.trace_start"() <{level = 10 : i32, message = "hqk,hkd->hqd"}> : () -> ()
    %cst_16 = arith.constant dense<0.000000e+00> : vector<4x8x8xf32>
    %30 = tpu.matmul %29, %18, %cst_16 {dimension_numbers = #tpu.dot_dimension_numbers<[2], [1], [1], [2], [0, 0, 0, 1, 1, 2], [0], [0]>} : vector<4x8x8xf32>, vector<4x8x8xf32>, vector<4x8x8xf32> -> vector<4x8x8xf32>
    "tpu.trace_stop"() : () -> ()
    %31 = tpu.transpose %30, [1, 0, 2] : vector<4x8x8xf32> -> vector<8x4x8xf32>
    %32 = vector.shape_cast %31 : vector<8x4x8xf32> to vector<8x32xf32>
    %c0_17 = arith.constant 0 : index
    %c0_18 = arith.constant 0 : index
    %33 = vector.load %arg6[%c0_17, %c0_18] : memref<32x32xf32, #tpu.memory_space<vmem>>, vector<32x32xf32>
    %cst_19 = arith.constant dense<0.000000e+00> : vector<8x32xf32>
    %34 = tpu.matmul %32, %33, %cst_19 {dimension_numbers = #tpu.dot_dimension_numbers<[1], [0], [0], [1], [0, 0, 1, 1], [], []>} : vector<8x32xf32>, vector<32x32xf32>, vector<8x32xf32> -> vector<8x32xf32>
    %c0_20 = arith.constant 0 : index
    %c0_21 = arith.constant 0 : index
    %35 = vector.load %arg10[%c0_20, %c0_21] : memref<1x32xf32, #tpu.memory_space<vmem>>, vector<1x32xf32>
    %36 = vector.broadcast %35 : vector<1x32xf32> to vector<8x32xf32>
    %37 = arith.addf %34, %36 : vector<8x32xf32>
    %c0_22 = arith.constant 0 : index
    %c0_23 = arith.constant 0 : index
    %c0_24 = arith.constant 0 : index
    %38 = vector.load %arg11[%c0_22, %c0_23, %c0_24] : memref<1x8x32xf32, #tpu.memory_space<vmem>>, vector<1x8x32xf32>
    %39 = vector.shape_cast %38 : vector<1x8x32xf32> to vector<8x32xf32>
    %40 = vector.shape_cast %37 : vector<8x32xf32> to vector<1x8x32xf32>
    tpu.vector_store %arg11[%c0_22, %c0_23, %c0_24], %40 {strides = array<i32>} : memref<1x8x32xf32, #tpu.memory_space<vmem>>, vector<1x8x32xf32>,
    return
  }
  func.func @transform_0(%arg0: i32, %arg1: i32) -> (i32, i32, i32) {
    %c0_i32 = arith.constant 0 : i32
    %c0_i32_0 = arith.constant 0 : i32
    %c0_i32_1 = arith.constant 0 : i32
    return %arg0, %c0_i32, %c0_i32_0 : i32, i32, i32
  }
  func.func @transform_1(%arg0: i32, %arg1: i32) -> (i32, i32) {
    %c0_i32 = arith.constant 0 : i32
    %c0_i32_0 = arith.constant 0 : i32
    %c0_i32_1 = arith.constant 0 : i32
    return %c0_i32, %c0_i32_0 : i32, i32
  }
  func.func @transform_2(%arg0: i32, %arg1: i32) -> (i32, i32) {
    %c0_i32 = arith.constant 0 : i32
    %c0_i32_0 = arith.constant 0 : i32
    %c0_i32_1 = arith.constant 0 : i32
    return %c0_i32, %c0_i32_0 : i32, i32
  }
  func.func @transform_3(%arg0: i32, %arg1: i32) -> (i32, i32) {
    %c0_i32 = arith.constant 0 : i32
    %c0_i32_0 = arith.constant 0 : i32
    %c0_i32_1 = arith.constant 0 : i32
    return %c0_i32, %c0_i32_0 : i32, i32
  }
  func.func @transform_4(%arg0: i32, %arg1: i32) -> (i32, i32) {
    %c0_i32 = arith.constant 0 : i32
    %c0_i32_0 = arith.constant 0 : i32
    %c0_i32_1 = arith.constant 0 : i32
    return %c0_i32, %c0_i32_0 : i32, i32
  }
  func.func @transform_5(%arg0: i32, %arg1: i32) -> (i32, i32) {
    %c0_i32 = arith.constant 0 : i32
    %c0_i32_0 = arith.constant 0 : i32
    %c0_i32_1 = arith.constant 0 : i32
    return %c0_i32, %c0_i32_0 : i32, i32
  }
  func.func @transform_6(%arg0: i32, %arg1: i32) -> (i32, i32) {
    %c0_i32 = arith.constant 0 : i32
    %c0_i32_0 = arith.constant 0 : i32
    %c0_i32_1 = arith.constant 0 : i32
    return %c0_i32, %c0_i32_0 : i32, i32
  }
  func.func @transform_7(%arg0: i32, %arg1: i32) -> (i32, i32) {
    %c0_i32 = arith.constant 0 : i32
    %c0_i32_0 = arith.constant 0 : i32
    %c0_i32_1 = arith.constant 0 : i32
    return %c0_i32, %c0_i32_0 : i32, i32
  }
  func.func @transform_8(%arg0: i32, %arg1: i32) -> (i32, i32) {
    %c0_i32 = arith.constant 0 : i32
    %c0_i32_0 = arith.constant 0 : i32
    %c0_i32_1 = arith.constant 0 : i32
    return %c0_i32, %c0_i32_0 : i32, i32
  }
  func.func @transform_9(%arg0: i32, %arg1: i32) -> (i32, i32, i32) {
    %c0_i32 = arith.constant 0 : i32
    %c0_i32_0 = arith.constant 0 : i32
    return %arg0, %arg1, %c0_i32 : i32, i32, i32
  }
}

</mosaic_0001>

<bundles_post_ra>
// kernel: tpu_custom_call.1
= control target key start
LH: loop header
LB: loop body
LE: loop exit
PB: predicated region body
PF: predicated region fallthrough
CT: control target
= control target key end

     0   :  { %s3258_s0 = inlined_call_operand.hbm [shape: f32[2,8,32], index: 0, kind: input, shape index: {}]   ;;  %s3259_s1 = inlined_call_operand.hbm [shape: f32[32,32], index: 1, kind: input, shape index: {}]   ;;  %s3260_s2 = inlined_call_operand.hbm [shape: f32[32,32], index: 2, kind: input, shape index: {}]   ;;  %s3261_s3 = inlined_call_operand.hbm [shape: f32[32,32], index: 3, kind: input, shape index: {}]   ;;  %s3262_s4 = inlined_call_operand.hbm [shape: f32[32,32], index: 4, kind: input, shape index: {}]   ;;  %s3263_s5 = inlined_call_operand.vmem [shape: f32[1,32], index: 5, kind: input, shape index: {}]   ;;  %s3264_s6 = inlined_call_operand.vmem [shape: f32[1,32], index: 6, kind: input, shape index: {}]   ;;  %s3265_s7 = inlined_call_operand.vmem [shape: f32[1,32], index: 7, kind: input, shape index: {}]   ;;  %s3266_s8 = inlined_call_operand.vmem [shape: f32[1,32], index: 8, kind: input, shape index: {}]   ;;  %s3267_s9 = inlined_call_operand.hbm [shape: f32[2,8,32], index: 9, kind: output, shape index: {}]  }
   0x1   :  { %3274 = sst [smem:[#allocation19_spill]] %s3259_s1 }
   0x2   :  { %3275 = sst [smem:[#allocation20_spill]] %s3266_s8 }
   0x3   :  { %3276 = sst [smem:[#allocation21_spill]] %s3267_s9 }
   0x4   :  { %14 = vsyncpa [#allocation5], 0 }
   0x5   :  { %16 = vsyncpa [#allocation5 + $0x1], 0 }
   0x6   :  { %17 = vsyncpa [#allocation8], 0 }
   0x7   :  { %18 = vsyncpa [#allocation11], 0 }
   0x8   :  { %19 = vsyncpa [#allocation6], 0 }
   0x9   :  { %21 = vsyncpa [#allocation6 + $0x1], 0  ;;  %s2776_s30 = smov 0   ;;  %s2778_s10 = smov 0  }
   0xa   :  { %s2780_s11 = smov 0   ;;  %s2782_s12 = smov 0  }
   0xb   :  { %s2784_s13 = smov 0   ;;  %s2786_s14 = smov 0  }
   0xc LB: > { %3277 = sst [smem:[#allocation18_spill]] %s2697_s12  ;;  %s3268_s15 = sadd.s32 4294967295, %s2705_s14   ;;  %s2705_s14 = sphi %s2786_s14, %s27_s14   ;;  %s2701_s13 = sphi %s2784_s13, %s3302_s13   ;;  %s2697_s12 = sphi %s2782_s12, %s3301_s12   ;;  %s2693_s11 = sphi %s2780_s11, %s3300_s11   ;;  %s2689_s10 = sphi %s2778_s10, %s3299_s10   ;;  %s2685_s30 = sphi %s2776_s30, %s3298_s30  }
   0xd   : > { %p2150_p0 = scmp.ge.s32.totalorder %s2705_s14, 1  ;;  %p2810_p1 = scmp.eq.s32.totalorder %s3268_s15, 0 }
   0xe   : > { %p266_p2 = scmp.lt.s32.totalorder %s2705_s14, 3  ;;  %s2707_s18 = smov [#allocation7]  }
   0xf   : > { %s3278_s16 = scalar_select %p2810_p1, 1, 0 }
  0x10   : > { %p2815_p3 = pnand %p2150_p0, %p266_p2  ;;  %s278_s19 = sshll.u32 %s2707_s18, 4  ;;  %s2819_s19 = int_to_ptr.vmem [resolvable:$true] %s278_s19 }
  0x11   : > { %s2708_s21 = smov [#allocation10]   ;;  %s2709_s23 = smov [#allocation9]  }
  0x12   : > { %s3279_s17 = scalar_select %p2815_p3, 1, 0 }
  0x13   : > { %p2361_p4 = pneg %p2815_p3  ;;  %s304_s22 = sshll.u32 %s2708_s21, 4  ;;  %s2830_s22 = int_to_ptr.vmem [resolvable:$true] %s304_s22 }
  0x14   : > { %s2832_s24 = sshll.u32 %s2709_s23, 4  ;;  %s3281_s1 = sld [smem:[#allocation19_spill]]  ;;  %s292_s24 = int_to_ptr.vmem [resolvable:$true] %s2832_s24 }
  0x15   : > { %p2826_p6 = pnand %p2361_p4, %p2810_p1 }
  0x17   : > { %p2842_p8 = pneg %p2826_p6 }
  0x1a   : > { %s2473_s27 = scalar_lea.hbm %s3281_s1, 512 }
  0x1b   : > { %p2474_p7 = scmp.ne.s32.totalorder %s3281_s1, %s2473_s27  ;;  %p2480_p11 = scmp.lt.u32.totalorder %s2473_s27, %s3281_s1 }
  0x1d   : > { %p2476_p9 = pnand %p2842_p8, %p2474_p7 }
  0x1f   : > { %p2477_p10 = pneg %p2476_p9 }
  0x21   : > { %p2482_p12 = pnand %p2480_p11, %p2477_p10 }
  0x23   : > { %2485 = shalt.err (!%p2482_p12)
}
  0x24   : > { %s2486_s25 = scalar_lea.vmem %s2819_s19, 512  ;;  %p2494_p4 = scmp.lt.s32.totalorder %s2819_s19, %s2819_s19 }
  0x25   : > { %p2487_p13 = scmp.ne.s32.totalorder %s2819_s19, %s2486_s25  ;;  %p2495_p5 = scmp.lt.s32.totalorder %s2486_s25, %s2486_s25 }
  0x27   : > { %p2489_p0 = pnand %p2487_p13, %p2842_p8  ;;  %p2496_p7 = por %p2495_p5, %p2494_p4 }
  0x29   : > { %p2490_p2 = pneg %p2489_p0 }
  0x2b   : > { %p2497_p9 = pnand %p2496_p7, %p2490_p2 }
  0x2d   : > { %2500 = shalt.err (!%p2497_p9)
}
  0x2e   : > { %s2710_s26 = smov 128   ;;  %s2711_s27 = smov 8  }
  0x2f   : > { %2364 = dma.hbm_to_vmem [thread:$0]  (!%p2826_p6), %s3281_s1, 512, %s2819_s19, [#allocation8], %s2710_s26, %s2710_s26, %s2711_s27  }
  0x30   : > { %s2501_s25 = scalar_lea.hbm %s3261_s3, 512 }
  0x31   : > { %p2502_p5 = scmp.ne.s32.totalorder %s3261_s3, %s2501_s25  ;;  %p2508_p12 = scmp.lt.u32.totalorder %s2501_s25, %s3261_s3 }
  0x33   : > { %p2504_p10 = pnand %p2502_p5, %p2842_p8 }
  0x35   : > { %p2505_p11 = pneg %p2504_p10 }
  0x37   : > { %p2510_p13 = pnand %p2508_p12, %p2505_p11 }
  0x39   : > { %2513 = shalt.err (!%p2510_p13)
}
  0x3a   : > { %s2514_s19 = scalar_lea.vmem %s2830_s22, 512  ;;  %p2522_p7 = scmp.lt.s32.totalorder %s2830_s22, %s2830_s22 }
  0x3b   : > { %p2515_p0 = scmp.ne.s32.totalorder %s2830_s22, %s2514_s19  ;;  %p2523_p9 = scmp.lt.s32.totalorder %s2514_s19, %s2514_s19 }
  0x3d   : > { %p2517_p2 = pnand %p2515_p0, %p2842_p8  ;;  %p2524_p5 = por %p2523_p9, %p2522_p7 }
  0x3f   : > { %p2518_p4 = pneg %p2517_p2 }
  0x41   : > { %p2525_p10 = pnand %p2524_p5, %p2518_p4 }
  0x43   : > { %2528 = shalt.err (!%p2525_p10)
}
  0x44   : > { %2370 = dma.hbm_to_vmem [thread:$0]  (!%p2826_p6), %s3261_s3, 512, %s2830_s22, [#allocation11], %s2710_s26, %s2710_s26, %s2711_s27  }
  0x45   : > { %s2529_s28 = scalar_lea.hbm %s3260_s2, 512 }
  0x46   : > { %p2530_p11 = scmp.ne.s32.totalorder %s3260_s2, %s2529_s28  ;;  %p2536_p0 = scmp.lt.u32.totalorder %s2529_s28, %s3260_s2 }
  0x48   : > { %p2532_p12 = pnand %p2530_p11, %p2842_p8 }
  0x4a   : > { %p2533_p13 = pneg %p2532_p12 }
  0x4c   : > { %p2538_p2 = pnand %p2536_p0, %p2533_p13 }
  0x4e   : > { %2541 = shalt.err (!%p2538_p2)
}
  0x4f   : > { %s2542_s19 = scalar_lea.vmem %s292_s24, 512  ;;  %p2550_p5 = scmp.lt.s32.totalorder %s292_s24, %s292_s24 }
  0x50   : > { %p2543_p4 = scmp.ne.s32.totalorder %s292_s24, %s2542_s19  ;;  %p2551_p10 = scmp.lt.s32.totalorder %s2542_s19, %s2542_s19 }
  0x52   : > { %p2545_p7 = pnand %p2543_p4, %p2842_p8  ;;  %p2552_p3 = por %p2551_p10, %p2550_p5 }
  0x54   : > { %p2546_p9 = pneg %p2545_p7 }
  0x56   : > { %p2553_p1 = pnand %p2552_p3, %p2546_p9 }
  0x58   : > { %2556 = shalt.err (!%p2553_p1)
}
  0x59   : > { %2367 = dma.hbm_to_vmem [thread:$0]  (!%p2826_p6), %s3260_s2, 512, %s292_s24, [#allocation8], %s2710_s26, %s2710_s26, %s2711_s27  }
  0x5a   : > { %s2712_s9 = smov [#allocation12]   ;;  %s2557_s29 = scalar_lea.hbm %s3262_s4, 512 }
  0x5b   : > { %s317_s12 = sshll.u32 %s2712_s9, 4  ;;  %p2558_p1 = scmp.ne.s32.totalorder %s3262_s4, %s2557_s29  ;;  %s318_s12 = int_to_ptr.vmem [resolvable:$true] %s317_s12 }
  0x5c   : > { %p2564_p12 = scmp.lt.u32.totalorder %s2557_s29, %s3262_s4 }
  0x5d   : > { %p2560_p3 = pnand %p2558_p1, %p2842_p8 }
  0x5f   : > { %p2561_p11 = pneg %p2560_p3 }
  0x61   : > { %p2566_p13 = pnand %p2564_p12, %p2561_p11 }
  0x63   : > { %2569 = shalt.err (!%p2566_p13)
}
  0x64   : > { %s2570_s24 = scalar_lea.vmem %s318_s12, 512  ;;  %p2578_p7 = scmp.lt.s32.totalorder %s318_s12, %s318_s12 }
  0x65   : > { %p2571_p0 = scmp.ne.s32.totalorder %s318_s12, %s2570_s24  ;;  %p2579_p9 = scmp.lt.s32.totalorder %s2570_s24, %s2570_s24 }
  0x67   : > { %p2573_p2 = pnand %p2571_p0, %p2842_p8  ;;  %p2580_p5 = por %p2579_p9, %p2578_p7 }
  0x69   : > { %p2574_p4 = pneg %p2573_p2 }
  0x6b   : > { %p2581_p10 = pnand %p2580_p5, %p2574_p4 }
  0x6d   : > { %2584 = shalt.err (!%p2581_p10)
}
  0x6e   : > { %2373 = dma.hbm_to_vmem [thread:$0]  (!%p2826_p6), %s3262_s4, 512, %s318_s12, [#allocation11], %s2710_s26, %s2710_s26, %s2711_s27  }
  0x6f   : > { %s2149_s20 = sadd.s32 4294967294, %s2705_s14   ;;  %s39_s18 = sadd.s32 1, %s2701_s13 }
  0x70   : > { %p41_p8 = scmp.ge.s32.totalorder %s39_s18, 2  ;;  %s46_s9 = sadd.s32 1, %s2693_s11 }
  0x71   : > { %p53_p1 = scmp.ne.s32.totalorder %s2693_s11, %s2689_s10  ;;  %p54_p3 = scmp.eq.s32.totalorder %s2705_s14, 0 }
  0x72   : > { %s3304_s18 = smov (%p41_p8, %s39_s18), 0  ;;  %p59_p12 = scmp.ne.s32.totalorder %s2689_s10, %s2685_s30 }
  0x73   : > { %p2943_p11 = por %p54_p3, %p53_p1  ;;  %s43_s26 = ssub.s32 %s2701_s13, %s3304_s18 }
  0x74   : > { %s3284_s27 = sadd.s32 4294967295, %s2705_s14   ;;  %p44_p13 = scmp.eq.s32.totalorder %s43_s26, 0 }
  0x75   : > { %p253_p6 = scmp.eq.s32.totalorder %s3284_s27, 1  ;;  %p3285_p0 = scmp.ne.s32.totalorder %s3278_s16, 0 }
  0x76   : > { %p259_p7 = scmp.eq.s32.totalorder %s2149_s20, 1  ;;  %p2386_p5 = scmp.lt.s32.totalorder %s2705_s14, 2 }
  0x77   : > { %p2955_p2 = por %p3285_p0, %p59_p12  ;;  %p2959_p4 = por %p253_p6, %p53_p1 }
  0x78   : > { %s2964_s29 = scalar_select %p44_p13, %s2693_s11, %s46_s9  }
  0x79   : > { %s3287_s28 = scalar_select %p2959_p4, 1, 0 }
  0x7a   : > { %p2966_p9 = por %p259_p7, %p59_p12  ;;  %s343_s23 = sand.u32 1, %s2693_s11  }
  0x7b   : > { %s2157_s25 = sshll.u32 %s2701_s13, 7  ;;  %s2156_s19 = sshll.u32 %s343_s23, 3 }
  0x7c   : > { %s3288_s21 = scalar_select %p2966_p9, 1, 0 }
  0x7d   : > { %s2976_s8 = scalar_lea.hbm %s3258_s0, %s2157_s25  ;;  %s347_s20 = scalar_lea.vmem [#allocation4], %s2156_s19 }
  0x7e   : > { %s354_s9 = sshll.u32 %s347_s20, 4  ;;  %p2980_p10 = pnand %p2386_p5, %p2943_p11  ;;  %s2984_s9 = int_to_ptr.vmem [resolvable:$true] %s354_s9 }
  0x7f   : > { %s344_s27 = scalar_lea.sflag [#allocation5], %s343_s23  ;;  %s2585_s1 = scalar_lea.hbm %s2976_s8, 128 }
  0x80   : > { %p2586_p8 = scmp.ne.s32.totalorder %s2976_s8, %s2585_s1  ;;  %p2587_p1 = pneg %p2980_p10 }
  0x81   : > { %s2590_s15 = scalar_lea.hbm %s3258_s0, 256  ;;  %p2591_p11 = scmp.lt.u32.totalorder %s2976_s8, %s3258_s0 }
  0x82   : > { %p2588_p3 = pnand %p2587_p1, %p2586_p8  ;;  %p2592_p6 = scmp.lt.u32.totalorder %s2590_s15, %s2585_s1 }
  0x83   : > { %p2594_p0 = scmp.lt.u32.totalorder %s2585_s1, %s2976_s8 }
  0x84   : > { %p2589_p12 = pneg %p2588_p3  ;;  %p2593_p13 = por %p2592_p6, %p2591_p11 }
  0x86   : > { %p2595_p7 = por %p2594_p0, %p2593_p13 }
  0x88   : > { %p2596_p5 = pnand %p2595_p7, %p2589_p12 }
  0x8a   : > { %2599 = shalt.err (!%p2596_p5)
}
  0x8b   : > { %s2600_s23 = scalar_lea.vmem %s2984_s9, 128  ;;  %s2713_s20 = smov [#allocation4]  }
  0x8c   : > { %p2601_p8 = scmp.ne.s32.totalorder %s2984_s9, %s2600_s23  ;;  %s2605_s25 = sshll.u32 %s2713_s20, 4  ;;  %s2606_s25 = int_to_ptr.vmem [resolvable:$false] %s2605_s25 }
  0x8d   : > { %s2607_s19 = scalar_lea.vmem %s2606_s25, 256  ;;  %p2608_p4 = scmp.lt.s32.totalorder %s2984_s9, %s2606_s25 }
  0x8e   : > { %p2603_p3 = pnand %p2601_p8, %p2587_p1  ;;  %p2609_p11 = scmp.lt.s32.totalorder %s2607_s19, %s2600_s23 }
  0x90   : > { %p2604_p9 = pneg %p2603_p3  ;;  %p2610_p6 = por %p2609_p11, %p2608_p4 }
  0x92   : > { %p2611_p13 = pnand %p2610_p6, %p2604_p9 }
  0x94   : > { %2614 = shalt.err (!%p2611_p13)
}
  0x95   : > { %2377 = dma.hbm_to_vmem [thread:$0]  (!%p2980_p10), %s2976_s8, 128, %s2984_s9, %s344_s27  }
  0x96   : > { %p3290_p12 = scmp.ne.s32.totalorder %s3279_s17, 0 }
  0x97   : > { %s3014_s1 = sand.u32 (!%p3290_p12), 1, %s2689_s10  }
  0x98   : > { %363 = sbr.rel (%p3290_p12) target bundleno = 1655 (0x677), region = 56  ;;  %s2159_s15 = sshll.u32 (!%p3290_p12), %s3014_s1, 3 }
  0x99   : > { %s366_s24 = scalar_lea.sflag (!%p3290_p12), [#allocation5], %s3014_s1  ;;  %s369_s22 = scalar_lea.vmem (!%p3290_p12), [#allocation4], %s2159_s15 }
  0x9f   : > { %2668 = dma.done.wait (%p2955_p2), %s366_s24, 128  }
  0xa0   : > { %2670 = vsyncadd (%p2955_p2), %s366_s24, 4294967168  ;;  %p3291_p4 = scmp.ne.s32.totalorder %s3278_s16, 0 }
  0xa2   : > { %2672 = dma.done.wait (%p3291_p4), [#allocation8], 1024  }
  0xa3   : > { %2674 = vsyncadd (%p3291_p4), [#allocation8], 4294966272 }
  0xa4   : > { %2676 = dma.done.wait (%p3291_p4), [#allocation11], 1024  }
  0xa5   : > { %2678 = vsyncadd (%p3291_p4), [#allocation11], 4294966272  ;;  %v2714_v0 = vmov 0.0|0.0   ;;  %vm2715_vm0 = vmmov 0   ;;  %v2716_v1 = vmov 0.0   ;;  %v425_v2 = vld [vmem:[#allocation9] sm:$0xff]  ;;  %v606_v32 = vlaneseq }
  0xa6   : > { %2317 = vmatprep.subr.bf16.mxu0 %v2714_v0  ;;  %2241 = vmatprep.mubr.msk.f32.mxu0 %vm2715_vm0, %v2716_v1  ;;  %v426_v3 = vld [vmem:[#allocation9 + $0x8] sm:$0xff]  ;;  %v427_v4 = vld [vmem:[#allocation9 + $0x10] sm:$0xff]  ;;  %v428_v6 = vld [vmem:[#allocation9 + $0x18] sm:$0xff]  ;;  %vm436_vm1 = vcmask 261120   ;;  %s2717_s12 = smov 104   ;;  %s2718_s8 = smov 120  }
  0xa7   : > { %2323 = vmatprep.subr.bf16.mxu1 %v2714_v0  ;;  %2252 = vmatprep.mubr.msk.f32.mxu1 %vm2715_vm0, %v2716_v1  ;;  %v2318_v5 = vpack.c.bf16 %v426_v3, %v425_v2  ;;  %v2321_v7 = vpack.c.bf16 %v428_v6, %v427_v4  ;;  %v895_v8 = vld [vmem:[#allocation7] sm:$0xff]  ;;  %v896_v9 = vld [vmem:[#allocation7 + $0x8] sm:$0xff]  ;;  %v424_v10 = vld [vmem:[%s369_s22] sm:$0xff]  ;;  %s2719_s27 = smov 112   ;;  %v2720_v30 = vmov 1983009808  }
  0xa8   : > { %v2330_v11 = vpack.c.bf16 %v896_v9, %v895_v8  ;;  %v897_v12 = vld [vmem:[#allocation7 + $0x10] sm:$0xff]  ;;  %v898_v13 = vld [vmem:[#allocation7 + $0x18] sm:$0xff]  ;;  %v510_v19 = vld [vmem:[#allocation10] sm:$0xff]  ;;  %v604_v31 = vunpack.c.l.s4 %v2720_v30  ;;  %v2721_v33 = vmov 1934713408   ;;  %v607_v36 = vshrl.u32 %v606_v32, 7 }
  0xa9   : > { %2319 = vmatpush3.bf16.msra.mxu0 %v2318_v5  ;;  %v2333_v14 = vpack.c.bf16 %v898_v13, %v897_v12  ;;  %v2165_v15 = vld [vmem:[%s3264_s6] ss:$0 sm:$0xff]  ;;  %v511_v20 = vld [vmem:[#allocation10 + $0x8] sm:$0xff]  ;;  %v513_v27 = vld [vmem:[#allocation10 + $0x18] sm:$0xff]  ;;  %v636_v34 = vunpack.c.l.s4 %v2721_v33  ;;  %vm737_vm2 = vcmask 64512   ;;  %s2722_s25 = smov 16  }
  0xaa   : > { %2320 = vmatprep.subr.bf16.mxu0 %v2714_v0  ;;  %v2173_v21 = vld [vmem:[%s3263_s5] ss:$0 sm:$0xff]  ;;  %v2324_v22 = vpack.c.bf16 %v511_v20, %v510_v19  ;;  %v605_v35 = vunpack.c.0.s8 %v604_v31  ;;  %s3292_s19 = sld [smem:[#allocation18_spill]]  ;;  %s2723_s24 = smov 8   ;;  %vm1925_vm3 = vcmask 130048   ;;  %vm1927_vm4 = vcmask 195584  }
  0xab   : > { %v512_v26 = vld [vmem:[#allocation10 + $0x10] sm:$0xff]  ;;  %v637_v39 = vunpack.c.0.s8 %v636_v34  ;;  %s2724_s22 = smov 24   ;;  %s419_s9 = scalar_lea.vmem [#allocation13], %s2159_s15 }
  0xac   : > { %2325 = vmatpush3.bf16.msra.mxu1 %v2324_v22  ;;  %v2327_v28 = vpack.c.bf16 %v513_v27, %v512_v26  ;;  %v3065_v40 = vsub.s32 %v605_v35, %v607_v36  ;;  %s2029_s26 = sshll.u32 %s419_s9, 4  ;;  %s3294_s20 = sld [smem:[#allocation21_spill]]  ;;  %s3210_s26 = int_to_ptr.vmem [resolvable:$true] %s2029_s26 }
  0xad   : > { %2322 = vmatpush3.bf16.msra.mxu0 %v2321_v7  ;;  %2326 = vmatprep.subr.bf16.mxu1 %v2714_v0  ;;  %v3067_v46 = vsub.s32 %v637_v39, %v607_v36  ;;  %p3295_p9 = scmp.ne.s32.totalorder %s3287_s28, 0  ;;  %s2725_s15 = smov [#allocation13]  }
  0xae   : > { %2329 = vmatprep.subr.bf16.mxu0 %v2714_v0 }
  0xb0   : > { %2242 = vmatmul.mubr.msk.f32.vlgmr.msra.gmra.mrb[0].mxu0 %vm436_vm1, %v424_v10  ;;  %2328 = vmatpush3.bf16.msra.mxu1 %v2327_v28 }
  0xb1   : > { %2331 = vmatpush3.bf16.msra.mxu0 %v2330_v11  ;;  %2263 = vmatprep.mubr.msk.f32.mxu0 %vm2715_vm0, %v2716_v1 }
  0xb2   : > { %2332 = vmatprep.subr.bf16.mxu0 %v2714_v0  ;;  %2266 = vmatprep.subr.mxu1 %v2716_v1 }
  0xb3   : > { %2253 = vmatmul.mubr.msk.f32.vlgmr.msra.gmra.mrb[0].mxu1 %vm436_vm1, %v424_v10 }
  0xb4   : > { %2268 = vmatprep.mubr.msk.f32.mxu1 %vm2715_vm0, %v2716_v1 }
  0xb5   : > { %2334 = vmatpush3.bf16.msra.mxu0 %v2333_v14 }
  0xb6   : > { %2286 = vmatprep.subr.mxu0 %v2716_v1 }
  0xb8   : > { %2264 = vmatmul.mubr.msk.f32.vlgmr.msra.gmra.mrb[2].mxu0 %vm436_vm1, %v424_v10 }
  0xb9   : > { %2288 = vmatprep.mubr.msk.f32.mxu0 %vm2715_vm0, %v2716_v1 }
 0x183   : > { %v506_v16 = vpop.f32.mrb[0].mxu0 }
 0x184   : > { %v507_v17 = vadd.f32 %v2165_v15, %v506_v16  ;;  %v2243_v18 = vpop.f32.mrb[1].mxu0 }
 0x186   : > { %598 = vrot.lane.b32.xlu1 %v507_v17, %s2717_s12  ;;  %592 = vrot.lane.b32.xlu0 %v507_v17, %s2718_s8 }
 0x18a   : > { %595 = vrot.lane.b32.xlu0 %v507_v17, %s2719_s27 }
 0x18b   : > { %v976_v23 = vpop.f32.mrb[2].mxu0 }
 0x18c   : > { %v977_v24 = vadd.f32 %v2173_v21, %v976_v23  ;;  %v2265_v25 = vpop.f32.mrb[3].mxu0 }
 0x18e   : > { %v980_v29 = vmul.f32 0.35355338, %v977_v24 }
 0x190   : > { %985 = vrot.lane.b32.xlu0 %v980_v29, %s2719_s27  ;;  %982 = vrot.lane.b32.xlu1 %v980_v29, %s2718_s8 }
 0x194   : > { %988 = vrot.lane.b32.xlu1 %v980_v29, %s2717_s12 }
 0x1f8   : > { %v599_v37 = vpop.permute.xlu1 %598  ;;  %v593_v38 = vpop.permute.xlu0 %592 }
 0x1f9   : > { %v617_v41 = vcombine.low %v593_v38, %v599_v37  ;;  %v618_v42 = vcombine.high %v593_v38, %v599_v37 }
 0x1fb   : > { %v625_v47 = vrot.slane %v617_v41, %v3065_v40  ;;  %v632_v48 = vrot.slane %v618_v42, %v3065_v40 }
 0x1fc   : > { %v596_v43 = vpop.permute.xlu0 %595 }
 0x1fd   : > { %v601_v44 = vcombine.low %v507_v17, %v596_v43  ;;  %v602_v45 = vcombine.high %v507_v17, %v596_v43 }
 0x1ff   : > { %v609_v49 = vrot.slane %v601_v44, %v3065_v40  ;;  %v616_v50 = vrot.slane %v602_v45, %v3065_v40 }
 0x201   : > { %v633_v51 = vcombine.low %v609_v49, %v625_v47  ;;  %v634_v52 = vcombine.high %v609_v49, %v625_v47  ;;  %v649_v53 = vcombine.low %v616_v50, %v632_v48  ;;  %v650_v54 = vcombine.high %v616_v50, %v632_v48 }
 0x202   : > { %v983_v55 = vpop.permute.xlu1 %982  ;;  %v986_v60 = vpop.permute.xlu0 %985 }
 0x203   : > { %v641_v56 = vrot.slane %v633_v51, %v3067_v46  ;;  %v648_v57 = vrot.slane %v634_v52, %v3067_v46  ;;  %v657_v58 = vrot.slane %v649_v53, %v3067_v46  ;;  %v664_v59 = vrot.slane %v650_v54, %v3067_v46 }
 0x204   : > { %v991_v3 = vcombine.low %v980_v29, %v986_v60  ;;  %v992_v4 = vcombine.high %v980_v29, %v986_v60 }
 0x205   : > { %v669_v61 = vcombine.low %v641_v56, %v648_v57  ;;  %v2169_v62 = vcombine.high %v641_v56, %v648_v57  ;;  %v685_v63 = vcombine.low %v657_v58, %v664_v59  ;;  %v2170_v2 = vcombine.high %v657_v58, %v664_v59 }
 0x206   : > { %v989_v5 = vpop.permute.xlu1 %988  ;;  %v999_v16 = vrot.slane %v991_v3, %v3065_v40  ;;  %v1006_v17 = vrot.slane %v992_v4, %v3065_v40 }
 0x207   : > { %v676_v6 = vrot.slane %v669_v61, %v3065_v40  ;;  %v684_v7 = vrot.slane %v2169_v62, %v3065_v40  ;;  %v692_v8 = vrot.slane %v685_v63, %v3065_v40  ;;  %v700_v9 = vrot.slane %v2170_v2, %v3065_v40  ;;  %v587_v62 = vpop.f32.mrb[0].mxu1 }
 0x208   : > { %v1007_v10 = vcombine.low %v983_v55, %v989_v5  ;;  %v1008_v11 = vcombine.high %v983_v55, %v989_v5  ;;  %v2254_v63 = vpop.f32.mrb[1].mxu1 }
 0x209   : > { %v701_v12 = vcombine.low %v676_v6, %v684_v7  ;;  %v702_v13 = vcombine.high %v676_v6, %v684_v7  ;;  %v717_v14 = vcombine.low %v692_v8, %v700_v9  ;;  %v718_v15 = vcombine.high %v692_v8, %v700_v9 }
 0x20a   : > { %v1015_v18 = vrot.slane %v1007_v10, %v3065_v40  ;;  %v1022_v19 = vrot.slane %v1008_v11, %v3065_v40 }
 0x20b   : > { %v709_v20 = vrot.slane %v701_v12, %v3067_v46  ;;  %v716_v21 = vrot.slane %v702_v13, %v3067_v46  ;;  %v725_v22 = vrot.slane %v717_v14, %v3067_v46  ;;  %v732_v23 = vrot.slane %v718_v15, %v3067_v46  ;;  %v2167_v14 = vld [vmem:[%s3265_s7] ss:$0 sm:$0xff] }
 0x20c   : > { %v1023_v24 = vcombine.low %v999_v16, %v1015_v18  ;;  %v1024_v25 = vcombine.high %v999_v16, %v1015_v18  ;;  %v1039_v26 = vcombine.low %v1006_v17, %v1022_v19  ;;  %v1040_v27 = vcombine.high %v1006_v17, %v1022_v19 }
 0x20d   : > { %v733_v28 = vcombine.low %v709_v20, %v725_v22  ;;  %v734_v29 = vcombine.high %v709_v20, %v725_v22  ;;  %v735_v30 = vcombine.low %v716_v21, %v732_v23  ;;  %v736_v31 = vcombine.high %v716_v21, %v732_v23 }
 0x20e   : > { %v1031_v32 = vrot.slane %v1023_v24, %v3067_v46  ;;  %v1038_v33 = vrot.slane %v1024_v25, %v3067_v46  ;;  %v1047_v34 = vrot.slane %v1039_v26, %v3067_v46  ;;  %v1054_v35 = vrot.slane %v1040_v27, %v3067_v46 }
 0x20f   : > { %738 = vst.msk [vmem:[#allocation2] sm:$0xff] %vm737_vm2, %v733_v28  ;;  %739 = vst.msk [vmem:[#allocation2 + $0x8] sm:$0xff] %vm737_vm2, %v734_v29  ;;  %v588_v15 = vadd.f32 %v2167_v14, %v587_v62 }
 0x210   : > { %740 = vst.msk [vmem:[#allocation2 + $0x10] sm:$0xff] %vm737_vm2, %v735_v30  ;;  %741 = vst.msk [vmem:[#allocation2 + $0x18] sm:$0xff] %vm737_vm2, %v736_v31  ;;  %v1059_v36 = vcombine.low %v1031_v32, %v1038_v33  ;;  %v2175_v37 = vcombine.high %v1031_v32, %v1038_v33  ;;  %v1075_v38 = vcombine.low %v1047_v34, %v1054_v35 }
 0x211   : > { %v2176_v39 = vcombine.high %v1047_v34, %v1054_v35 }
 0x212   : > { %v1066_v41 = vrot.slane %v1059_v36, %v3065_v40  ;;  %v1074_v42 = vrot.slane %v2175_v37, %v3065_v40  ;;  %v1082_v43 = vrot.slane %v1075_v38, %v3065_v40 }
 0x213   : > { %v1090_v44 = vrot.slane %v2176_v39, %v3065_v40 }
 0x214   : > { %v1091_v45 = vcombine.low %v1066_v41, %v1074_v42  ;;  %v1092_v51 = vcombine.high %v1066_v41, %v1074_v42 }
 0x215   : > { %v1107_v47 = vcombine.low %v1082_v43, %v1090_v44  ;;  %v1108_v52 = vcombine.high %v1082_v43, %v1090_v44 }
 0x216   : > { %v1127_v48 = vld [vmem:[#allocation2] sm:$0xff]  ;;  %v1099_v49 = vrot.slane %v1091_v45, %v3067_v46  ;;  %v1128_v54 = vld [vmem:[#allocation2 + $0x8] sm:$0xff]  ;;  %v1106_v56 = vrot.slane %v1092_v51, %v3067_v46 }
 0x217   : > { %v1115_v50 = vrot.slane %v1107_v47, %v3067_v46  ;;  %2267 = vmatpush3.xpose.msk.msra.mxu1 %vm737_vm2, %v1127_v48  ;;  %v1122_v57 = vrot.slane %v1108_v52, %v3067_v46  ;;  %v1129_v58 = vld [vmem:[#allocation2 + $0x10] sm:$0xff]  ;;  %v1130_v60 = vld [vmem:[#allocation2 + $0x18] sm:$0xff] }
 0x218   : > { %2271 = vmatprep.subr.mxu1 %v2716_v1 }
 0x219   : > { %v1123_v53 = vcombine.low %v1099_v49, %v1115_v50  ;;  %v1124_v55 = vcombine.high %v1099_v49, %v1115_v50  ;;  %v1125_v59 = vcombine.low %v1106_v56, %v1122_v57  ;;  %v1126_v61 = vcombine.high %v1106_v56, %v1122_v57 }
 0x21b   : > { %2269 = vmatmul.mubr.msk.f32.vlgmr.msra.gmra.mrb[2].mxu1 %vm737_vm2, %v1123_v53 }
 0x21c   : > { %2272 = vmatpush3.xpose.msk.msra.mxu1 %vm737_vm2, %v1128_v54  ;;  %2273 = vmatprep.mubr.msk.f32.mxu1 %vm2715_vm0, %v2716_v1 }
 0x21d   : > { %2276 = vmatprep.subr.mxu1 %v2716_v1 }
 0x21f   : > { %2274 = vmatmul.mubr.msk.f32.vlgmr.msra.gmra.mrb[4].mxu1 %vm737_vm2, %v1124_v55 }
 0x220   : > { %2277 = vmatpush3.xpose.msk.msra.mxu1 %vm737_vm2, %v1129_v58  ;;  %2278 = vmatprep.mubr.msk.f32.mxu1 %vm2715_vm0, %v2716_v1 }
 0x221   : > { %2281 = vmatprep.subr.mxu1 %v2716_v1 }
 0x223   : > { %2279 = vmatmul.mubr.msk.f32.vlgmr.msra.gmra.mrb[6].mxu1 %vm737_vm2, %v1125_v59 }
 0x224   : > { %2282 = vmatpush3.xpose.msk.msra.mxu1 %vm737_vm2, %v1130_v60  ;;  %2283 = vmatprep.mubr.msk.f32.mxu1 %vm2715_vm0, %v2716_v1 }
 0x225   : > { %2291 = vmatprep.subr.mxu1 %v2716_v1 }
 0x227   : > { %2284 = vmatmul.mubr.msk.f32.vlgmr.msra.gmra.mrb[8].mxu1 %vm737_vm2, %v1126_v61 }
 0x228   : > { %2293 = vmatprep.mubr.msk.f32.mxu1 %vm2715_vm0, %v2716_v1 }
 0x2ee   : > { %v1208_v2 = vpop.f32.mrb[2].mxu1 }
 0x2ef   : > { %v2270_v3 = vpop.f32.mrb[3].mxu1  ;;  %v1440_v4 = vsel %vm737_vm2, %v1208_v2, -inf }
 0x2f0   : > { %1441 = vmax.xlane.f32.xlu0 %v1440_v4 }
 0x2f2   : > { %v1284_v5 = vpop.f32.mrb[4].mxu1 }
 0x2f3   : > { %v2275_v6 = vpop.f32.mrb[5].mxu1  ;;  %v1443_v7 = vsel %vm737_vm2, %v1284_v5, -inf }
 0x2f4   : > { %1444 = vmax.xlane.f32.xlu1 %v1443_v7 }
 0x2f6   : > { %v1360_v8 = vpop.f32.mrb[6].mxu1 }
 0x2f7   : > { %v2280_v9 = vpop.f32.mrb[7].mxu1  ;;  %v1446_v10 = vsel %vm737_vm2, %v1360_v8, -inf }
 0x2f8   : > { %1447 = vmax.xlane.f32.xlu0 %v1446_v10 }
 0x2fa   : > { %v1436_v11 = vpop.f32.mrb[8].mxu1 }
 0x2fb   : > { %v2285_v12 = vpop.f32.mrb[9].mxu1  ;;  %v1449_v13 = vsel %vm737_vm2, %v1436_v11, -inf }
 0x2fc   : > { %1450 = vmax.xlane.f32.xlu0 %v1449_v13 }
 0x305   : > { %743 = vrot.lane.b32.xlu1 %v588_v15, %s2718_s8  ;;  %s2194_s8 = sshll.u32 %s3292_s19, 7  ;;  %s2615_s19 = scalar_lea.vmem %s3210_s26, 128 }
 0x306   : > { %p2616_p2 = scmp.ne.s32.totalorder %s3210_s26, %s2615_s19 }
 0x308   : > { %p2617_p10 = pnand %p2616_p2, %p3295_p9 }
 0x309   : > { %749 = vrot.lane.b32.xlu1 %v588_v15, %s2717_s12  ;;  %s3293_s12 = sld [smem:[#allocation20_spill]] }
 0x30a   : > { %p2618_p1 = pneg %p2617_p10 }
 0x312   : > { %746 = vrot.lane.b32.xlu0 %v588_v15, %s2719_s27 }
 0x37d   : > { %v1442_v16 = vpop.xlane.xlu0 %1441 }
 0x37e   : > { %v1452_v17 = vsub.f32 %v1208_v2, %v1442_v16 }
 0x380   : > { %v1456_v18 = vmul.f32 1.442695, %v1452_v17 }
 0x381   : > { %v1445_v19 = vpop.xlane.xlu1 %1444 }
 0x382   : > { %2457 = vpow2.f32 %v1456_v18  ;;  %v1453_v20 = vsub.f32 %v1284_v5, %v1445_v19 }
 0x384   : > { %v1458_v21 = vmul.f32 1.442695, %v1453_v20 }
 0x385   : > { %v744_v22 = vpop.permute.xlu1 %743  ;;  %v1448_v23 = vpop.xlane.xlu0 %1447 }
 0x386   : > { %2459 = vpow2.f32 %v1458_v21  ;;  %v1454_v24 = vsub.f32 %v1360_v8, %v1448_v23 }
 0x388   : > { %v1460_v25 = vmul.f32 1.442695, %v1454_v24 }
 0x389   : > { %v750_v26 = vpop.permute.xlu1 %749  ;;  %v1451_v27 = vpop.xlane.xlu0 %1450 }
 0x38a   : > { %2461 = vpow2.f32 %v1460_v25  ;;  %v1455_v28 = vsub.f32 %v1436_v11, %v1451_v27  ;;  %v768_v30 = vcombine.low %v744_v22, %v750_v26  ;;  %v769_v31 = vcombine.high %v744_v22, %v750_v26 }
 0x38c   : > { %v3135_v29 = vpop.eup %2457  ;;  %v1462_v32 = vmul.f32 1.442695, %v1455_v28  ;;  %v776_v38 = vrot.slane %v768_v30, %v3065_v40  ;;  %v783_v39 = vrot.slane %v769_v31, %v3065_v40  ;;  %v1929_v31 = vld [vmem:[#allocation12] sm:$0xff] }
 0x38d   : > { %v747_v33 = vpop.permute.xlu0 %746  ;;  %v1464_v34 = vsel %vm737_vm2, %v3135_v29, 0.0 }
 0x38e   : > { %2463 = vpow2.f32 %v1462_v32  ;;  %v752_v35 = vcombine.low %v588_v15, %v747_v33  ;;  %v753_v36 = vcombine.high %v588_v15, %v747_v33  ;;  %1465 = vadd.xlane.f32.xlu1 %v1464_v34  ;;  %v1930_v32 = vld [vmem:[#allocation12 + $0x8] sm:$0xff] }
 0x38f   : > { %v2336_v33 = vpack.c.bf16 %v1930_v32, %v1929_v31 }
 0x390   : > { %v3139_v37 = vpop.eup %2459  ;;  %v760_v41 = vrot.slane %v752_v35, %v3065_v40  ;;  %v767_v42 = vrot.slane %v753_v36, %v3065_v40 }
 0x391   : > { %v1467_v43 = vsel %vm737_vm2, %v3139_v37, 0.0 }
 0x392   : > { %v784_v44 = vcombine.low %v760_v41, %v776_v38  ;;  %v785_v45 = vcombine.high %v760_v41, %v776_v38  ;;  %v800_v47 = vcombine.low %v767_v42, %v783_v39  ;;  %v801_v48 = vcombine.high %v767_v42, %v783_v39  ;;  %1468 = vadd.xlane.f32.xlu0 %v1467_v43 }
 0x394   : > { %v2462_v49 = vpop.eup %2461  ;;  %v792_v50 = vrot.slane %v784_v44, %v3067_v46  ;;  %v799_v51 = vrot.slane %v785_v45, %v3067_v46  ;;  %v808_v52 = vrot.slane %v800_v47, %v3067_v46  ;;  %v815_v53 = vrot.slane %v801_v48, %v3067_v46 }
 0x395   : > { %v1470_v54 = vsel %vm737_vm2, %v2462_v49, 0.0 }
 0x396   : > { %v820_v55 = vcombine.low %v792_v50, %v799_v51  ;;  %v2171_v56 = vcombine.high %v792_v50, %v799_v51  ;;  %v836_v57 = vcombine.low %v808_v52, %v815_v53  ;;  %v2172_v58 = vcombine.high %v808_v52, %v815_v53  ;;  %1471 = vadd.xlane.f32.xlu0 %v1470_v54  ;;  %v1931_v54 = vld [vmem:[#allocation12 + $0x10] sm:$0xff] }
 0x398   : > { %v2464_v59 = vpop.eup %2463  ;;  %v827_v60 = vrot.slane %v820_v55, %v3065_v40  ;;  %v835_v61 = vrot.slane %v2171_v56, %v3065_v40  ;;  %v843_v62 = vrot.slane %v836_v57, %v3065_v40  ;;  %v851_v63 = vrot.slane %v2172_v58, %v3065_v40  ;;  %v1932_v55 = vld [vmem:[#allocation12 + $0x18] sm:$0xff] }
 0x399   : > { %v1473_v2 = vsel %vm737_vm2, %v2464_v59, 0.0 }
 0x39a   : > { %v852_v3 = vcombine.low %v827_v60, %v835_v61  ;;  %v853_v4 = vcombine.high %v827_v60, %v835_v61  ;;  %v868_v5 = vcombine.low %v843_v62, %v851_v63  ;;  %v869_v6 = vcombine.high %v843_v62, %v851_v63  ;;  %1474 = vadd.xlane.f32.xlu1 %v1473_v2 }
 0x39b   : > { %v2339_v60 = vpack.c.bf16 %v1932_v55, %v1931_v54 }
 0x39c   : > { %v860_v7 = vrot.slane %v852_v3, %v3067_v46  ;;  %v867_v8 = vrot.slane %v853_v4, %v3067_v46  ;;  %v876_v9 = vrot.slane %v868_v5, %v3067_v46  ;;  %v883_v10 = vrot.slane %v869_v6, %v3067_v46 }
 0x39e   : > { %v884_v11 = vcombine.low %v860_v7, %v876_v9  ;;  %v885_v12 = vcombine.high %v860_v7, %v876_v9  ;;  %v886_v13 = vcombine.low %v867_v8, %v883_v10  ;;  %v887_v14 = vcombine.high %v867_v8, %v883_v10 }
 0x3a0   : > { %888 = vst.msk [vmem:[#allocation3] sm:$0xff] %vm737_vm2, %v884_v11  ;;  %889 = vst.msk [vmem:[#allocation3 + $0x8] sm:$0xff] %vm737_vm2, %v885_v12 }
 0x3a1   : > { %890 = vst.msk [vmem:[#allocation3 + $0x10] sm:$0xff] %vm737_vm2, %v886_v13  ;;  %891 = vst.msk [vmem:[#allocation3 + $0x18] sm:$0xff] %vm737_vm2, %v887_v14 }
 0x3a7   : > { %v1131_v15 = vld [vmem:[#allocation3] sm:$0xff]  ;;  %v1132_v16 = vld [vmem:[#allocation3 + $0x8] sm:$0xff] }
 0x3a8   : > { %2287 = vmatpush3.msra.mxu0 %v1131_v15  ;;  %2292 = vmatpush3.msra.mxu1 %v1132_v16  ;;  %v1133_v23 = vld [vmem:[#allocation3 + $0x10] sm:$0xff]  ;;  %v1134_v26 = vld [vmem:[#allocation3 + $0x18] sm:$0xff] }
 0x3a9   : > { %2296 = vmatprep.subr.mxu0 %v2716_v1  ;;  %2301 = vmatprep.subr.mxu1 %v2716_v1 }
 0x41b   : > { %v1466_v17 = vpop.xlane.xlu1 %1465 }
 0x41c   : > { %2465 = vrcp.f32 %v1466_v17 }
 0x41f   : > { %v1469_v18 = vpop.xlane.xlu0 %1468 }
 0x420   : > { %2467 = vrcp.f32 %v1469_v18 }
 0x423   : > { %v1472_v19 = vpop.xlane.xlu0 %1471 }
 0x424   : > { %2469 = vrcp.f32 %v1472_v19 }
 0x426   : > { %v2466_v20 = vpop.eup %2465 }
 0x427   : > { %v1480_v21 = vmul.f32 %v2466_v20, %v3135_v29  ;;  %v1475_v22 = vpop.xlane.xlu1 %1474 }
 0x428   : > { %2471 = vrcp.f32 %v1475_v22 }
 0x429   : > { %2289 = vmatmul.mubr.msk.f32.vlgmr.msra.gmra.mrb[4].mxu0 %vm737_vm2, %v1480_v21 }
 0x42a   : > { %v2468_v24 = vpop.eup %2467  ;;  %2297 = vmatpush3.msra.mxu0 %v1133_v23  ;;  %2298 = vmatprep.mubr.msk.f32.mxu0 %vm2715_vm0, %v2716_v1  ;;  %v2191_v23 = vld [vmem:[%s3293_s12] ss:$0 sm:$0xff] }
 0x42b   : > { %v1481_v25 = vmul.f32 %v2468_v24, %v3139_v37  ;;  %2335 = vmatprep.subr.bf16.mxu0 %v2714_v0 }
 0x42d   : > { %2294 = vmatmul.mubr.msk.f32.vlgmr.msra.gmra.mrb[10].mxu1 %vm737_vm2, %v1481_v25 }
 0x42e   : > { %v2470_v27 = vpop.eup %2469  ;;  %2302 = vmatpush3.msra.mxu1 %v1134_v26  ;;  %2303 = vmatprep.mubr.msk.f32.mxu1 %vm2715_vm0, %v2716_v1 }
 0x42f   : > { %v1482_v28 = vmul.f32 %v2470_v27, %v2462_v49 }
 0x431   : > { %2299 = vmatmul.mubr.msk.f32.vlgmr.msra.gmra.mrb[6].mxu0 %vm737_vm2, %v1482_v28 }
 0x432   : > { %v2472_v29 = vpop.eup %2471  ;;  %2314 = vmatprep.mubr.msk.f32.mxu0 %vm2715_vm0, %v2716_v1  ;;  %2337 = vmatpush3.bf16.msra.mxu0 %v2336_v33 }
 0x433   : > { %v1483_v30 = vmul.f32 %v2472_v29, %v2464_v59  ;;  %2338 = vmatprep.subr.bf16.mxu0 %v2714_v0 }
 0x435   : > { %2304 = vmatmul.mubr.msk.f32.vlgmr.msra.gmra.mrb[12].mxu1 %vm737_vm2, %v1483_v30 }
 0x436   : > { %2340 = vmatpush3.bf16.msra.mxu0 %v2339_v60 }
 0x4fc   : > { %v1553_v34 = vpop.f32.mrb[4].mxu0 }
 0x4fd   : > { %v2290_v35 = vpop.f32.mrb[5].mxu0 }
 0x500   : > { %v1626_v36 = vpop.f32.mrb[10].mxu1 }
 0x501   : > { %v2295_v37 = vpop.f32.mrb[11].mxu1 }
 0x504   : > { %v1699_v38 = vpop.f32.mrb[6].mxu0 }
 0x505   : > { %v1776_v39 = vcombine.low %v1553_v34, %v1699_v38  ;;  %v1777_v41 = vcombine.high %v1553_v34, %v1699_v38  ;;  %v2300_v42 = vpop.f32.mrb[7].mxu0 }
 0x507   : > { %v1784_v47 = vrot.slane %v1776_v39, %v3065_v40  ;;  %v1791_v48 = vrot.slane %v1777_v41, %v3065_v40 }
 0x508   : > { %v1772_v43 = vpop.f32.mrb[12].mxu1 }
 0x509   : > { %v1792_v44 = vcombine.low %v1626_v36, %v1772_v43  ;;  %v1793_v1 = vcombine.high %v1626_v36, %v1772_v43  ;;  %v2305_v45 = vpop.f32.mrb[13].mxu1 }
 0x50b   : > { %v1800_v49 = vrot.slane %v1792_v44, %v3065_v40  ;;  %v1807_v0 = vrot.slane %v1793_v1, %v3065_v40 }
 0x50d   : > { %v1808_v50 = vcombine.low %v1784_v47, %v1800_v49  ;;  %v1809_v51 = vcombine.high %v1784_v47, %v1800_v49  ;;  %v1824_v52 = vcombine.low %v1791_v48, %v1807_v0  ;;  %v1825_v53 = vcombine.high %v1791_v48, %v1807_v0 }
 0x50f   : > { %v1816_v56 = vrot.slane %v1808_v50, %v3067_v46  ;;  %v1823_v57 = vrot.slane %v1809_v51, %v3067_v46  ;;  %v1832_v58 = vrot.slane %v1824_v52, %v3067_v46  ;;  %v1839_v59 = vrot.slane %v1825_v53, %v3067_v46 }
 0x511   : > { %v1844_v61 = vcombine.low %v1816_v56, %v1823_v57  ;;  %v2189_v62 = vcombine.high %v1816_v56, %v1823_v57  ;;  %v1860_v63 = vcombine.low %v1832_v58, %v1839_v59  ;;  %v2190_v2 = vcombine.high %v1832_v58, %v1839_v59 }
 0x513   : > { %v1851_v3 = vrot.slane %v1844_v61, %v3065_v40  ;;  %v1859_v4 = vrot.slane %v2189_v62, %v3065_v40  ;;  %v1867_v5 = vrot.slane %v1860_v63, %v3065_v40  ;;  %v1875_v6 = vrot.slane %v2190_v2, %v3065_v40 }
 0x515   : > { %v1877_v7 = vcombine.high %v1851_v3, %v1859_v4  ;;  %v1893_v8 = vcombine.high %v1867_v5, %v1875_v6  ;;  %v1876_v9 = vcombine.low %v1851_v3, %v1859_v4  ;;  %v1892_v10 = vcombine.low %v1867_v5, %v1875_v6 }
 0x517   : > { %v1891_v11 = vrot.slane %v1877_v7, %v3067_v46  ;;  %v1907_v12 = vrot.slane %v1893_v8, %v3067_v46  ;;  %v1884_v13 = vrot.slane %v1876_v9, %v3067_v46  ;;  %v1900_v14 = vrot.slane %v1892_v10, %v3067_v46 }
 0x519   : > { %v1910_v15 = vcombine.low %v1891_v11, %v1907_v12  ;;  %v1909_v16 = vcombine.high %v1884_v13, %v1900_v14  ;;  %v1911_v17 = vcombine.high %v1891_v11, %v1907_v12  ;;  %v1908_v18 = vcombine.low %v1884_v13, %v1900_v14 }
 0x51b   : > { %1917 = vrot.lane.b32.xlu1 %v1910_v15, %s2722_s25  ;;  %1913 = vrot.lane.b32.xlu0 %v1909_v16, %s2723_s24  ;;  %s3208_s25 = scalar_lea.hbm %s3294_s20, %s2194_s8  ;;  %s2015_s24 = scalar_lea.sflag [#allocation6], %s3014_s1 }
 0x51f   : > { %1921 = vrot.lane.b32.xlu1 %v1911_v17, %s2724_s22  ;;  %s2619_s22 = sshll.u32 %s2725_s15, 4  ;;  %s2620_s22 = int_to_ptr.vmem [resolvable:$false] %s2619_s22 }
 0x520   : > { %s2621_s16 = scalar_lea.vmem %s2620_s22, 256  ;;  %p2622_p0 = scmp.lt.s32.totalorder %s3210_s26, %s2620_s22 }
 0x521   : > { %p2623_p7 = scmp.lt.s32.totalorder %s2621_s16, %s2615_s19 }
 0x523   : > { %p2624_p5 = por %p2623_p7, %p2622_p0 }
 0x525   : > { %p2625_p8 = pnand %p2624_p5, %p2618_p1 }
 0x58d   : > { %v1918_v40 = vpop.permute.xlu1 %1917  ;;  %v1914_v19 = vpop.permute.xlu0 %1913 }
 0x58e   : > { %v1924_v20 = vsel %vm737_vm2, %v1908_v18, %v1914_v19 }
 0x58f   : > { %v1926_v21 = vsel %vm1925_vm3, %v1924_v20, %v1918_v40 }
 0x591   : > { %v1922_v46 = vpop.permute.xlu1 %1921 }
 0x592   : > { %v1928_v22 = vsel %vm1927_vm4, %v1926_v21, %v1922_v46 }
 0x593   : > { %2315 = vmatmul.mubr.msk.f32.vlgmr.msra.gmra.mrb[8].mxu0 %vm436_vm1, %v1928_v22 }
 0x666   : > { %v2009_v24 = vpop.f32.mrb[8].mxu0 }
 0x667   : > { %v2010_v25 = vadd.f32 %v2191_v23, %v2009_v24  ;;  %v2316_v26 = vpop.f32.mrb[9].mxu0 }
 0x669   : > { %2013 = vst.msk [vmem:[%s419_s9] sm:$0xff] %vm436_vm1, %v2010_v25 }
 0x66a   : > { %2628 = shalt.err (!%p2625_p8)
}
 0x66b   : > { %s2629_s1 = scalar_lea.hbm %s3208_s25, 128  ;;  %s2633_s8 = scalar_lea.hbm %s3294_s20, 256 }
 0x66c   : > { %p2630_p3 = scmp.ne.s32.totalorder %s3208_s25, %s2629_s1  ;;  %p2634_p13 = scmp.lt.u32.totalorder %s3208_s25, %s3294_s20 }
 0x66d   : > { %p2635_p12 = scmp.lt.u32.totalorder %s2633_s8, %s2629_s1  ;;  %p2637_p2 = scmp.lt.u32.totalorder %s2629_s1, %s3208_s25 }
 0x66e   : > { %p2631_p11 = pnand %p2630_p3, %p3295_p9 }
 0x66f   : > { %p2636_p4 = por %p2635_p12, %p2634_p13 }
 0x670   : > { %p2632_p6 = pneg %p2631_p11 }
 0x671   : > { %p2638_p10 = por %p2637_p2, %p2636_p4 }
 0x673   : > { %p2639_p1 = pnand %p2638_p10, %p2632_p6 }
 0x675   : > { %2642 = shalt.err (!%p2639_p1)
}
 0x676   : > { %2359 = dma.vmem_to_hbm [thread:$0]  (%p3295_p9), %s3210_s26, 128, %s3208_s25, %s2015_s24  }
 0x677 PF: > { %s2041_s23 = sand.u32 1, %s2685_s30   ;;  %p3296_p0 = scmp.ne.s32.totalorder %s3288_s21, 0 }
 0x678   : > { %p3297_p7 = scmp.ge.s32.totalorder %s2705_s14, 2  ;;  %s2042_s19 = scalar_lea.sflag [#allocation6], %s2041_s23 }
 0x67a   : > { %p2379_p5 = pnand %p3297_p7, %p3296_p0 }
 0x67c   : > { %2680 = dma.done.wait (!%p2379_p5), %s2042_s19, 128  }
 0x67d   : > { %2682 = vsyncadd (!%p2379_p5), %s2042_s19, 4294967168  ;;  %s27_s14 = sadd.s32 1, %s2705_s14   ;;  %s3298_s30 = smov %s2689_s10 }
 0x67e   : > { %p24_p8 = scmp.ge.s32.totalorder %s27_s14, 4   ;;  %s3299_s10 = smov %s2693_s11 }
 0x67f   : > { %s3300_s11 = smov %s2964_s29  ;;  %s3301_s12 = smov %s2701_s13 }
 0x680   : > { %s3302_s13 = smov %s3304_s18  ;;  %26 = sbr.rel (!%p24_p8) target bundleno = 12 (0xc), region = 122 }
 0x687   :  { %2047 = vsyncpa [#allocation5], 1 }
 0x688   :  { %2049 = vsyncpa [#allocation5 + $0x1], 1 }
 0x689   :  { %2050 = vsyncpa [#allocation8], 1 }
 0x68a   :  { %2051 = vsyncpa [#allocation11], 1 }
 0x68b   :  { %2052 = vsyncpa [#allocation6], 1 }
 0x68c   :  { %2054 = vsyncpa [#allocation6 + $0x1], 1 }

</bundles_post_ra>
